<compile_context>
chip_gen: v7x
topology: tpu7x:2x2x1
jax: 0.10.0
libtpu: 0.0.40
codegen_flags: <defaults>
</compile_context>

<pallas_src>
import math
from functools import partial

import numpy as np
import jax
import jax.numpy as jnp
from jax.experimental import pallas as pl
from jax.experimental.pallas import tpu as pltpu

FULL_DEPTH = 3
MAX_DEPTH = 6


def _sinposemb_kernel(xyz_ref, didx_ref, freq_ref, phase_ref, table_ref,
                      out_ref, *, num_depth, pack):
    t = xyz_ref.shape[0]

    # arg[r, p*NE + j] = xyz[r*P+p, axis(j)] * inv_freq(j)
    # via a [T, 3P] x [3P, P*NE] MXU dot against a block-diagonal constant.
    arg = jnp.dot(xyz_ref[...], freq_ref[...],
                  preferred_element_type=jnp.float32)              # [T, P*NE]
    # interleaved sin/cos with one EUP op per element (cos(x) = sin(x + pi/2))
    pos_emb = jnp.sin(arg + phase_ref[...])                        # [T, P*NE]

    # depth-embedding lookup: packed one-hot @ block-diagonal table on the MXU.
    # (out-of-range depth indices yield a zero row instead of erroring like
    #  nn.Embedding; fine for valid inputs, and ragged/garbage rows are masked)
    didx = didx_ref[...]                                           # [T, P] i32
    iota = jax.lax.broadcasted_iota(jnp.int32, (t, pack * num_depth), 1)
    onehot = jnp.zeros((t, pack * num_depth), jnp.float32)
    for p in range(pack):                                          # static unroll
        sel = didx[:, p:p + 1] + p * num_depth                     # [T, 1]
        onehot = onehot + (iota == sel).astype(jnp.float32)
    depth_emb = jnp.dot(onehot, table_ref[...],
                        preferred_element_type=jnp.float32)        # [T, P*NE]

    out_ref[...] = pos_emb + depth_emb


def _channels_for(num_embed):
    channels = int(math.ceil(num_embed / 6) * 2)
    if channels % 2:
        channels += 1
    return channels


def sin_pos_emb(xyz, depth_idx, depth_table, num_embed):
    """xyz: [N,3] f32, depth_idx: [N] int, depth_table: [num_depth, num_embed] f32."""
    n = xyz.shape[0]
    num_depth, ne = depth_table.shape
    assert ne == num_embed
    channels = _channels_for(num_embed)

    # lane-packing factor: pack P rows into one (P*num_embed = 128)-lane output row
    pack = 128 // num_embed if (num_embed <= 128 and 128 % num_embed == 0) else 1
    ne_p = pack * num_embed

    # ---- column-constant tables built at trace time with numpy ----
    col = np.arange(num_embed)
    axis = col // channels                     # 0 -> x, 1 -> y, 2 -> z
    local = col % channels
    inv_freq = np.power(100.0, -(2.0 * (local // 2)) / channels).astype(np.float32)
    phase1 = np.where(local % 2 == 0, 0.0, np.pi / 2.0).astype(np.float32)
    f1 = np.zeros((3, num_embed), np.float32)
    f1[axis, col] = inv_freq                   # axis-select * inv_freq as a matmul
    # block-diagonal packed versions
    freq = np.zeros((3 * pack, ne_p), np.float32)
    for p in range(pack):
        freq[3 * p:3 * (p + 1), p * num_embed:(p + 1) * num_embed] = f1
    phase = np.tile(phase1, pack)[None, :]     # [1, P*NE]

    # block-diagonal depth-embedding table (runtime array, tiny: [P*nd, 128])
    table = jnp.zeros((pack * num_depth, ne_p), jnp.float32)
    for p in range(pack):
        table = table.at[p * num_depth:(p + 1) * num_depth,
                         p * num_embed:(p + 1) * num_embed].set(
                             depth_table.astype(jnp.float32))

    # ---- row packing: free row-major reshapes; pad only if n % pack != 0 ----
    xyz = xyz.astype(jnp.float32)
    didx = depth_idx.reshape(-1).astype(jnp.int32)
    n_pad = -(-n // pack) * pack
    if n_pad != n:                             # rare ragged-pack case only
        xyz = jnp.pad(xyz, ((0, n_pad - n), (0, 0)))
        didx = jnp.pad(didx, (0, n_pad - n))
    rows = n_pad // pack
    xyz_p = xyz.reshape(rows, 3 * pack)        # [rows, 12], byte-identical
    didx_p = didx.reshape(rows, pack)          # [rows, 4]

    # ---- tile selection: double-buffer-aware VMEM budget (~10 MiB total) ----
    bytes_per_row = 4 * (ne_p + 3 * pack + pack)          # out + xyz + didx
    t_cap = max(8, min(8192, ((10 << 20) // (2 * bytes_per_row)) // 8 * 8))
    if rows <= 8:
        tile = rows                            # single whole-array block
    else:
        target = -(-rows // 8)                 # aim for >= ~8 grid steps (v7x: 2 TCs)
        tile = max(8, min(t_cap, -(-target // 8) * 8))
    grid = (pl.cdiv(rows, tile),)              # ragged last block masked by Pallas

    kernel = partial(_sinposemb_kernel, num_depth=num_depth, pack=pack)

    out = pl.pallas_call(
        kernel,
        out_shape=jax.ShapeDtypeStruct((rows, ne_p), jnp.float32),
        grid=grid,
        in_specs=[
            pl.BlockSpec((tile, 3 * pack), lambda i: (i, 0)),           # packed xyz
            pl.BlockSpec((tile, pack), lambda i: (i, 0)),               # packed depth idx
            pl.BlockSpec((3 * pack, ne_p), lambda i: (0, 0)),           # freq (const)
            pl.BlockSpec((1, ne_p), lambda i: (0, 0)),                  # phase (const)
            pl.BlockSpec((pack * num_depth, ne_p), lambda i: (0, 0)),   # depth table
        ],
        out_specs=pl.BlockSpec((tile, ne_p), lambda i: (i, 0)),
        compiler_params=pltpu.CompilerParams(
            dimension_semantics=("parallel",)),
    )(xyz_p, didx_p, jnp.asarray(freq), jnp.asarray(phase), table)

    out = out.reshape(n_pad, num_embed)        # free, row-major byte-identical
    return out if n_pad == n else out[:n]
    # TODO(synk): optionally emit bf16 output (halves the store stream) if
    # downstream consumers tolerate reduced precision.


def _reference(xyz, depth_idx, depth_table, num_embed):
    """Pure-JAX reference mirroring the PyTorch forward exactly."""
    channels = _channels_for(num_embed)
    inv_freq = 1.0 / (100.0 ** (jnp.arange(0, channels, 2, dtype=jnp.float32)
                                / channels))

    def get_emb(sin_inp):
        e = jnp.stack((jnp.sin(sin_inp), jnp.cos(sin_inp)), axis=-1)
        return e.reshape(e.shape[0], -1)

    embs = [get_emb(xyz[:, i][:, None] * inv_freq[None, :]) for i in range(3)]
    emb = jnp.zeros((xyz.shape[0], channels * 3), dtype=jnp.float32)
    emb = emb.at[:, :channels].set(embs[0])
    emb = emb.at[:, channels:2 * channels].set(embs[1])
    emb = emb.at[:, 2 * channels:].set(embs[2])
    pos = emb[:, :num_embed]
    return pos + depth_table[depth_idx]


if __name__ == "__main__":
    num_embed = 32
    num_depth = MAX_DEPTH - FULL_DEPTH + 1      # 4 rows in the Embedding table

    fn = jax.jit(sin_pos_emb, static_argnums=3)
    key = jax.random.PRNGKey(0)

    ok = True
    for n_nodes in (8, 13, 2500):               # packed / ragged-pack / multi-tile
        k1, k2, k3, key = jax.random.split(key, 4)
        # octree.xyz: per-node (x, y, z) coordinates
        xyz = jax.random.uniform(k1, (n_nodes, 3), jnp.float32, 0.0, 16.0)
        # octree.depth_idx: per-node index into the depth embedding table
        depth_idx = jax.random.randint(k2, (n_nodes,), 0, num_depth, jnp.int32)
        # nn.Embedding weight ~ N(0, 1), deterministic init
        depth_table = jax.random.normal(k3, (num_depth, num_embed), jnp.float32)

        out = jax.block_until_ready(fn(xyz, depth_idx, depth_table, num_embed))
        ref = _reference(xyz, depth_idx, depth_table, num_embed)
        assert out.shape == (n_nodes, num_embed)
        if not jnp.allclose(out, ref, atol=1e-5, rtol=1e-5):
            ok = False
            print(f"mismatch vs reference for N={n_nodes}, "
                  f"max abs err={float(jnp.max(jnp.abs(out - ref)))}")

    if ok:
        print("KERNEL_OK")
</pallas_src>

<mosaic_0001>
module attributes {stable_mosaic.version = 11 : i64} {
  func.func @_sinposemb_kernel(%arg0: i32, %arg1: memref<2x12xf32, #tpu.memory_space<vmem>>, %arg2: memref<2x4xi32, #tpu.memory_space<vmem>>, %arg3: memref<12x128xf32, #tpu.memory_space<vmem>>, %arg4: memref<1x128xf32, #tpu.memory_space<vmem>>, %arg5: memref<16x128xf32, #tpu.memory_space<vmem>>, %arg6: memref<2x128xf32, #tpu.memory_space<vmem>>) attributes {dimension_semantics = [#tpu.dimension_semantics<parallel>], iteration_bounds = array<i64: 1>, scalar_prefetch = 0 : i64, scratch_operands = 0 : i64, tpu.core_type = #tpu.core_type<tc>, window_params = [{transform_indices = @transform_0, window_bounds = array<i64: 2, 12>}, {transform_indices = @transform_1, window_bounds = array<i64: 2, 4>}, {pipeline_mode = #tpu.pipeline_mode<synchronous>, transform_indices = @transform_2, window_bounds = array<i64: 12, 128>}, {pipeline_mode = #tpu.pipeline_mode<synchronous>, transform_indices = @transform_3, window_bounds = array<i64: 1, 128>}, {pipeline_mode = #tpu.pipeline_mode<synchronous>, transform_indices = @transform_4, window_bounds = array<i64: 16, 128>}, {transform_indices = @transform_5, window_bounds = array<i64: 2, 128>}]} {
    %c0 = arith.constant 0 : index
    %c0_0 = arith.constant 0 : index
    %0 = vector.load %arg1[%c0, %c0_0] : memref<2x12xf32, #tpu.memory_space<vmem>>, vector<2x12xf32>
    %c0_1 = arith.constant 0 : index
    %c0_2 = arith.constant 0 : index
    %1 = vector.load %arg3[%c0_1, %c0_2] : memref<12x128xf32, #tpu.memory_space<vmem>>, vector<12x128xf32>
    %cst = arith.constant dense<0.000000e+00> : vector<2x128xf32>
    %2 = tpu.matmul %0, %1, %cst {dimension_numbers = #tpu.dot_dimension_numbers<[1], [0], [0], [1], [0, 0, 1, 1], [], []>} : vector<2x12xf32>, vector<12x128xf32>, vector<2x128xf32> -> vector<2x128xf32>
    %c0_3 = arith.constant 0 : index
    %c0_4 = arith.constant 0 : index
    %3 = vector.load %arg4[%c0_3, %c0_4] : memref<1x128xf32, #tpu.memory_space<vmem>>, vector<1x128xf32>
    %4 = vector.broadcast %3 : vector<1x128xf32> to vector<2x128xf32>
    %5 = arith.addf %2, %4 : vector<2x128xf32>
    %6 = math.sin %5 : vector<2x128xf32>
    %c0_5 = arith.constant 0 : index
    %c0_6 = arith.constant 0 : index
    %7 = vector.load %arg2[%c0_5, %c0_6] : memref<2x4xi32, #tpu.memory_space<vmem>>, vector<2x4xi32>
    %8 = tpu.iota {dimensions = array<i32: 1>} : vector<2x16xi32>
    %cst_7 = arith.constant 0.000000e+00 : f32
    %9 = vector.broadcast %cst_7 : f32 to vector<2x16xf32>
    %10 = vector.extract_strided_slice %7 {offsets = [0, 0], sizes = [2, 1], strides = [1, 1]} : vector<2x4xi32> to vector<2x1xi32>
    %c0_i32 = arith.constant 0 : i32
    %11 = vector.broadcast %c0_i32 : i32 to vector<2x1xi32>
    %12 = arith.addi %10, %11 : vector<2x1xi32>
    %13 = vector.broadcast %12 : vector<2x1xi32> to vector<2x16xi32>
    %14 = arith.cmpi eq, %8, %13 : vector<2x16xi32>
    %15 = arith.extui %14 : vector<2x16xi1> to vector<2x16xi32>
    %16 = arith.sitofp %15 : vector<2x16xi32> to vector<2x16xf32>
    %17 = arith.addf %9, %16 : vector<2x16xf32>
    %18 = vector.extract_strided_slice %7 {offsets = [0, 1], sizes = [2, 1], strides = [1, 1]} : vector<2x4xi32> to vector<2x1xi32>
    %c4_i32 = arith.constant 4 : i32
    %19 = vector.broadcast %c4_i32 : i32 to vector<2x1xi32>
    %20 = arith.addi %18, %19 : vector<2x1xi32>
    %21 = vector.broadcast %20 : vector<2x1xi32> to vector<2x16xi32>
    %22 = arith.cmpi eq, %8, %21 : vector<2x16xi32>
    %23 = arith.extui %22 : vector<2x16xi1> to vector<2x16xi32>
    %24 = arith.sitofp %23 : vector<2x16xi32> to vector<2x16xf32>
    %25 = arith.addf %17, %24 : vector<2x16xf32>
    %26 = vector.extract_strided_slice %7 {offsets = [0, 2], sizes = [2, 1], strides = [1, 1]} : vector<2x4xi32> to vector<2x1xi32>
    %c8_i32 = arith.constant 8 : i32
    %27 = vector.broadcast %c8_i32 : i32 to vector<2x1xi32>
    %28 = arith.addi %26, %27 : vector<2x1xi32>
    %29 = vector.broadcast %28 : vector<2x1xi32> to vector<2x16xi32>
    %30 = arith.cmpi eq, %8, %29 : vector<2x16xi32>
    %31 = arith.extui %30 : vector<2x16xi1> to vector<2x16xi32>
    %32 = arith.sitofp %31 : vector<2x16xi32> to vector<2x16xf32>
    %33 = arith.addf %25, %32 : vector<2x16xf32>
    %34 = vector.extract_strided_slice %7 {offsets = [0, 3], sizes = [2, 1], strides = [1, 1]} : vector<2x4xi32> to vector<2x1xi32>
    %c12_i32 = arith.constant 12 : i32
    %35 = vector.broadcast %c12_i32 : i32 to vector<2x1xi32>
    %36 = arith.addi %34, %35 : vector<2x1xi32>
    %37 = vector.broadcast %36 : vector<2x1xi32> to vector<2x16xi32>
    %38 = arith.cmpi eq, %8, %37 : vector<2x16xi32>
    %39 = arith.extui %38 : vector<2x16xi1> to vector<2x16xi32>
    %40 = arith.sitofp %39 : vector<2x16xi32> to vector<2x16xf32>
    %41 = arith.addf %33, %40 : vector<2x16xf32>
    %c0_8 = arith.constant 0 : index
    %c0_9 = arith.constant 0 : index
    %42 = vector.load %arg5[%c0_8, %c0_9] : memref<16x128xf32, #tpu.memory_space<vmem>>, vector<16x128xf32>
    %cst_10 = arith.constant dense<0.000000e+00> : vector<2x128xf32>
    %43 = tpu.matmul %41, %42, %cst_10 {dimension_numbers = #tpu.dot_dimension_numbers<[1], [0], [0], [1], [0, 0, 1, 1], [], []>} : vector<2x16xf32>, vector<16x128xf32>, vector<2x128xf32> -> vector<2x128xf32>
    %44 = arith.addf %6, %43 : vector<2x128xf32>
    %c0_11 = arith.constant 0 : index
    %c0_12 = arith.constant 0 : index
    %45 = vector.load %arg6[%c0_11, %c0_12] : memref<2x128xf32, #tpu.memory_space<vmem>>, vector<2x128xf32>
    tpu.vector_store %arg6[%c0_11, %c0_12], %44 {strides = array<i32>} : memref<2x128xf32, #tpu.memory_space<vmem>>, vector<2x128xf32>,
    return
  }
  func.func @transform_0(%arg0: i32) -> (i32, i32) {
    %c0_i32 = arith.constant 0 : i32
    %c0_i32_0 = arith.constant 0 : i32
    return %arg0, %c0_i32 : i32, i32
  }
  func.func @transform_1(%arg0: i32) -> (i32, i32) {
    %c0_i32 = arith.constant 0 : i32
    %c0_i32_0 = arith.constant 0 : i32
    return %arg0, %c0_i32 : i32, i32
  }
  func.func @transform_2(%arg0: i32) -> (i32, i32) {
    %c0_i32 = arith.constant 0 : i32
    %c0_i32_0 = arith.constant 0 : i32
    %c0_i32_1 = arith.constant 0 : i32
    return %c0_i32, %c0_i32_0 : i32, i32
  }
  func.func @transform_3(%arg0: i32) -> (i32, i32) {
    %c0_i32 = arith.constant 0 : i32
    %c0_i32_0 = arith.constant 0 : i32
    %c0_i32_1 = arith.constant 0 : i32
    return %c0_i32, %c0_i32_0 : i32, i32
  }
  func.func @transform_4(%arg0: i32) -> (i32, i32) {
    %c0_i32 = arith.constant 0 : i32
    %c0_i32_0 = arith.constant 0 : i32
    %c0_i32_1 = arith.constant 0 : i32
    return %c0_i32, %c0_i32_0 : i32, i32
  }
  func.func @transform_5(%arg0: i32) -> (i32, i32) {
    %c0_i32 = arith.constant 0 : i32
    %c0_i32_0 = arith.constant 0 : i32
    return %arg0, %c0_i32 : i32, i32
  }
}

</mosaic_0001>

<bundles_post_ra>
// kernel: sin_pos_emb.1
= control target key start
LH: loop header
LB: loop body
LE: loop exit
PB: predicated region body
PF: predicated region fallthrough
CT: control target
= control target key end

     0   :  { %vm34_vm0 = vcmask 1043456   ;;  %v394_v0 = vmov 0   ;;  %v395_v2 = vmov 0.0|0.0   ;;  %vm396_vm1 = vmmov 1   ;;  %s483_s1 = inlined_call_operand.vmem [shape: s32[2,4], index: 1, kind: input, shape index: {}]   ;;  %s484_s2 = inlined_call_operand.vmem [shape: f32[12,128], index: 2, kind: input, shape index: {}]   ;;  %s485_s0 = inlined_call_operand.vmem [shape: f32[2,12], index: 0, kind: input, shape index: {}]   ;;  %s486_s4 = inlined_call_operand.vmem [shape: f32[16,128], index: 4, kind: input, shape index: {}]   ;;  %s487_s3 = inlined_call_operand.vmem [shape: f32[1,128], index: 3, kind: input, shape index: {}]   ;;  %s488_s5 = inlined_call_operand.vmem [shape: f32[2,128], index: 5, kind: output, shape index: {}]  }
   0x1   :  { %385 = vset.pattern.permute.xlu0 %v394_v0  ;;  %v212_v1 = vld [vmem:[%s483_s1] sm:$0x3]  ;;  %360 = vmatprep.subr.bf16.mxu0 %v395_v2  ;;  %v22_v4 = vld [vmem:[%s484_s2 + $0x8] sm:$0xf]  ;;  %vm362_vm2 = vmpackc.low %vm34_vm0, %vm396_vm1  ;;  %v397_v6 = vmov 2   ;;  %vm398_vm3 = vmmov 0   ;;  %v213_v17 = vlaneseq }
   0x2   :  { %v21_v3 = vld [vmem:[%s484_s2] sm:$0xff]  ;;  %216 = vperm.xlu0 %385, %v212_v1   ;;  %387 = vset.pattern.permute.xlu1 %v397_v6  ;;  %v399_v7 = vmov 0.0   ;;  %v230_v8 = vadd.s32 8, %v212_v1  ;;  %v222_v9 = vadd.s32 4, %v212_v1  ;;  %vm30_vm4 = vcmask 97280   ;;  %v247_v15 = vld [vmem:[%s486_s4 + $0x8] sm:$0xff] }
   0x3   :  { %v361_v5 = vpack.c.bf16 %v22_v4, %v21_v3  ;;  %350 = vmatprep.mubr.msk.f32.mxu0 %vm398_vm3, %v399_v7  ;;  %364 = vmatprep.subr.bf16.mxu1 %v395_v2  ;;  %v20_v10 = vld [vmem:[%s485_s0] sm:$0x3]  ;;  %v400_v11 = vmov 1   ;;  %v238_v12 = vadd.s32 12, %v212_v1  ;;  %v401_v13 = vmov 3  }
   0x4   :  { %357 = vmatprep.mubr.msk.f32.mxu1 %vm398_vm3, %v399_v7  ;;  %232 = vperm.xlu1 %387, %v230_v8   ;;  %v246_v14 = vld [vmem:[%s486_s4] sm:$0xff]  ;;  %v214_v18 = vand.u32 127, %v213_v17  ;;  %vm248_vm9 = vcmask 130048   ;;  %v402_v44 = vmov 2102212464  }
   0x5   :  { %363 = vmatpush3.bf16.msk.msra.mxu0 %vm362_vm2, %v361_v5  ;;  %v365_v16 = vpack.c.bf16 %v247_v15, %v246_v14  ;;  %v328_v30 = vld [vmem:[%s487_s3] ss:$0 sm:$0xff]  ;;  %v403_v46 = vmov 920167782   ;;  %v404_v49 = vmov 683565275  }
   0x6   :  { %386 = vset.pattern.permute.xlu0 %v400_v11  ;;  %v405_v51 = vmov 2475754826   ;;  %v406_v53 = vmov 2131351028   ;;  %v407_v56 = vmov 1326507024  }
   0x7   :  { %224 = vperm.xlu0 %386, %v222_v9   ;;  %366 = vmatpush3.bf16.msra.mxu1 %v365_v16 }
   0x8   :  { %351 = vmatmul.mubr.msk.f32.vlgmr.msra.gmra.mrb[0].mxu0 %vm30_vm4, %v20_v10  ;;  %388 = vset.pattern.permute.xlu1 %v401_v13 }
   0x9   :  { %240 = vperm.xlu1 %388, %v238_v12  }
   0xb   :  { %389 = vset.pattern.permute.xlu0 %v401_v13 }
  0x81   :  { %v217_v19 = vpop.permute.xlu0 %216 }
  0x82   :  { %vm218_vm5 = vcmp.eq.s32.totalorder %v214_v18, %v217_v19 }
  0x83   :  { %v233_v20 = vpop.permute.xlu1 %232  ;;  %v335_v22 = vsel %vm218_vm5, 1.0, %v399_v7 }
  0x84   :  { %vm234_vm6 = vcmp.eq.s32.totalorder %v214_v18, %v233_v20 }
  0x85   :  { %v337_v26 = vsel %vm234_vm6, 1.0, %v399_v7 }
  0x86   :  { %v225_v21 = vpop.permute.xlu0 %224 }
  0x87   :  { %vm226_vm7 = vcmp.eq.s32.totalorder %v214_v18, %v225_v21 }
  0x88   :  { %v336_v23 = vsel %vm226_vm7, 1.0, %v399_v7  ;;  %v241_v25 = vpop.permute.xlu1 %240 }
  0x89   :  { %v229_v24 = vadd.f32 %v336_v23, %v335_v22  ;;  %vm242_vm8 = vcmp.eq.s32.totalorder %v214_v18, %v241_v25 }
  0x8a   :  { %v338_v28 = vsel %vm242_vm8, 1.0, %v399_v7 }
  0x8b   :  { %v237_v27 = vadd.f32 %v337_v26, %v229_v24 }
  0x8d   :  { %v245_v29 = vadd.f32 %v338_v28, %v237_v27 }
  0x8f   :  { %358 = vmatmul.mubr.msk.f32.vlgmr.msra.gmra.mrb[0].mxu1 %vm248_vm9, %v245_v29 }
  0xdb   :  { %v104_v31 = vpop.f32.mrb[0].mxu0 }
  0xdc   :  { %v459_v32 = vadd.f32 %v328_v30, %v104_v31  ;;  %v352_v33 = vpop.f32.mrb[1].mxu0 }
  0xde   :  { %v111_v34 = vand.u32 2139095040, %v459_v32  ;;  %v108_v37 = vand.u32 2147483647, %v459_v32  ;;  %vm110_vm1 = vcmp.lt.s32.totalorder %v459_v32, 0  ;;  %vm200_vm6 = vweird.f32 %v459_v32 }
  0xe0   :  { %v112_v35 = vshrl.u32 %v111_v34, 23  ;;  %v115_v40 = vand.u32 8388607, %v108_v37  ;;  %vm109_vm2 = vcmp.le.f32.partialorder %v108_v37, 0.7853982 }
  0xe2   :  { %v331_v36 = vadd.s32 4294967169, %v112_v35  ;;  %v116_v48 = vor.u32 8388608, %v115_v40 }
  0xe4   :  { %v118_v38 = vadd.s32 1, %v331_v36  ;;  %v156_v3 = vshll.u32 %v116_v48, 8 }
  0xe6   :  { %vm119_vm10 = vcmp.gt.s32.totalorder %v118_v38, 0 }
  0xe7   :  { %v120_v39 = vsel %vm119_vm10, %v118_v38, 0 }
  0xe8   :  { %v122_v41 = vand.u32 31, %v120_v39  ;;  %v121_v42 = vshrl.u32 %v120_v39, 5 }
  0xea   :  { %v123_v43 = vsub.s32 32, %v122_v41  ;;  %v134_v45 = vshll.u32 %v402_v44, %v122_v41  ;;  %v137_v47 = vshll.u32 %v403_v46, %v122_v41  ;;  %v125_v50 = vshll.u32 %v404_v49, %v122_v41 }
  0xeb   :  { %v128_v52 = vshll.u32 %v405_v51, %v122_v41  ;;  %v131_v54 = vshll.u32 %v406_v53, %v122_v41  ;;  %vm143_vm11 = vcmp.lt.s32.totalorder %v121_v42, 4  ;;  %vm140_vm12 = vcmp.lt.s32.totalorder %v121_v42, 1 }
  0xec   :  { %v135_v55 = vshrl.u32 %v403_v46, %v123_v43  ;;  %v138_v57 = vshrl.u32 %v407_v56, %v123_v43  ;;  %v124_v58 = vshrl.u32 %v404_v49, %v123_v43  ;;  %v126_v59 = vshrl.u32 %v405_v51, %v123_v43 }
  0xed   :  { %v129_v60 = vshrl.u32 %v406_v53, %v123_v43  ;;  %v132_v61 = vshrl.u32 %v402_v44, %v123_v43  ;;  %vm142_vm13 = vcmp.lt.s32.totalorder %v121_v42, 3  ;;  %vm141_vm14 = vcmp.lt.s32.totalorder %v121_v42, 2 }
  0xee   :  { %v136_v62 = vor.u32 %v135_v55, %v134_v45  ;;  %v139_v63 = vor.u32 %v138_v57, %v137_v47  ;;  %v127_v0 = vor.u32 %v126_v59, %v125_v50 }
  0xef   :  { %v130_v1 = vor.u32 %v129_v60, %v128_v52  ;;  %v133_v2 = vor.u32 %v132_v61, %v131_v54 }
  0xf0   :  { %v149_v4 = vsel %vm143_vm11, %v136_v62, 920167782  ;;  %v153_v5 = vsel %vm143_vm11, %v139_v63, 1326507024  ;;  %v144_v6 = vsel %vm140_vm12, %v124_v58, %v127_v0 }
  0xf1   :  { %v145_v7 = vsel %vm143_vm11, %v133_v2, 2102212464  ;;  %v148_v8 = vsel %vm140_vm12, %v127_v0, %v130_v1  ;;  %v150_v9 = vsel %vm142_vm13, %v133_v2, %v149_v4  ;;  %v152_v10 = vsel %vm140_vm12, %v130_v1, %v133_v2 }
  0xf2   :  { %v146_v11 = vsel %vm142_vm13, %v130_v1, %v145_v7  ;;  %v151_v12 = vsel %vm141_vm14, %v148_v8, %v150_v9  ;;  %v154_v13 = vsel %vm142_vm13, %v136_v62, %v153_v5 }
  0xf3   :  { %v147_v14 = vsel %vm141_vm14, %v144_v6, %v146_v11  ;;  %v155_v15 = vsel %vm141_vm14, %v152_v10, %v154_v13  ;;  %v465_v16 = vmul.u32.u64.low %v156_v3, %v151_v12  ;;  %v466_v17 = vmul.u32.u64.high %v156_v3, %v151_v12, %v465_v16 }
  0xf4   :  { %v468_v18 = vmul.u32.u64.low %v156_v3, %v155_v15  ;;  %v469_v19 = vmul.u32.u64.high %v156_v3, %v155_v15, %v468_v18  ;;  %v163_v20 = vmul.u32 %v156_v3, %v147_v14 }
  0xf5   :  { %v166_v21 = vadd.s32 1, %v466_v17 }
  0xf6   :  { %vm165_vm15 = vc.u32 %v469_v19, %v465_v16  ;;  %v164_v33 = vadd.s32 %v465_v16, %v469_v19 }
  0xf7   :  { %v167_v22 = vsel %vm165_vm15, %v166_v21, %v466_v17 }
  0xf8   :  { %v168_v23 = vadd.s32 %v167_v22, %v163_v20 }
  0xfa   :  { %v169_v24 = vadd.s32 536870912, %v168_v23 }
  0xfc   :  { %v170_v25 = vshrl.u32 %v169_v24, 30 }
  0xfe   :  { %v171_v26 = vshll.u32 %v170_v25, 30  ;;  %v194_v47 = vsub.s32 4, %v170_v25 }
 0x100   :  { %v172_v27 = vsub.s32 %v168_v23, %v171_v26  ;;  %v195_v50 = vsel %vm110_vm1, %v194_v47, %v170_v25 }
 0x101   :  { %v197_v52 = vsel %vm109_vm2, 0, %v195_v50 }
 0x102   :  { %v174_v28 = vsub.s32 0, %v172_v27  ;;  %v201_v53 = vadd.s32 3, %v197_v52 }
 0x104   :  { %v332_v29 = vmin.u32 %v174_v28, %v172_v27  ;;  %v202_v54 = vand.u32 3, %v201_v53 }
 0x106   :  { %v176_v30 = vclz %v332_v29  ;;  %vm207_vm3 = vcmp.eq.s32.totalorder %v202_v54, 2  ;;  %vm204_vm4 = vcmp.eq.s32.totalorder %v202_v54, 0  ;;  %vm203_vm5 = vcmp.lt.s32.totalorder %v202_v54, 2 }
 0x108   :  { %v333_v31 = vadd.s32 4294967294, %v176_v30 }
 0x10a   :  { %vm334_vm0 = vcmp.lt.s32.totalorder %v333_v31, 0 }
 0x10b   :  { %v179_v34 = vsel %vm334_vm0, 0, %v333_v31 }
 0x10c   :  { %v180_v35 = vsub.s32 32, %v179_v34  ;;  %v181_v36 = vshll.u32 %v172_v27, %v179_v34  ;;  %v184_v38 = vsub.s32 4294967266, %v179_v34 }
 0x10e   :  { %v182_v39 = vshrl.u32 %v164_v33, %v180_v35  ;;  %v185_v40 = vadd.s32 127, %v184_v38 }
 0x110   :  { %v183_v41 = vor.u32 %v182_v39, %v181_v36  ;;  %v186_v42 = vshll.u32 %v185_v40, 23 }
 0x112   :  { %v187_v43 = vor.u32 4788187, %v186_v42  ;;  %v190_v44 = vcvt.s32.f32 %v183_v41 }
 0x114   :  { %v188_v45 = vand.u32 2147483647, %v187_v43 }
 0x116   :  { %v191_v46 = vmul.f32 %v190_v44, %v188_v45 }
 0x118   :  { %v192_v48 = vxor.u32 2147483648, %v191_v46 }
 0x11a   :  { %v193_v49 = vsel %vm110_vm1, %v192_v48, %v191_v46 }
 0x11b   :  { %v196_v51 = vsel %vm109_vm2, %v459_v32, %v193_v49 }
 0x11c   :  { %390 = vcosq.f32 %v196_v51 }
 0x11d   :  { %392 = vsinq.f32 %v196_v51 }
 0x126   :  { %v391_v55 = vpop.eup %390 }
 0x127   :  { %v393_v56 = vpop.eup %392  ;;  %v208_v57 = vxor.u32 2147483648, %v391_v55 }
 0x128   :  { %v205_v58 = vxor.u32 2147483648, %v393_v56 }
 0x129   :  { %v209_v59 = vsel %vm207_vm3, %v208_v57, %v393_v56 }
 0x12a   :  { %v206_v60 = vsel %vm204_vm4, %v391_v55, %v205_v58 }
 0x12b   :  { %v210_v37 = vsel %vm203_vm5, %v206_v60, %v209_v59 }
 0x12c   :  { %v211_v61 = vsel %vm200_vm6, nan, %v210_v37 }
 0x162   :  { %v318_v62 = vpop.f32.mrb[0].mxu1 }
 0x163   :  { %v322_v63 = vadd.f32 %v318_v62, %v211_v61  ;;  %v359_v0 = vpop.f32.mrb[1].mxu1 }
 0x165   :  { %323 = vst [vmem:[%s488_s5] sm:$0x3] %v322_v63 }

</bundles_post_ra>
